<compile_context>
chip_gen: v6e
topology: v6e:2x2x1
jax: 0.10.0
libtpu: 0.0.40
codegen_flags: <defaults>
</compile_context>

<pallas_src>
import functools

import jax
import jax.numpy as jnp
import numpy as np
from jax import lax
from jax.experimental import pallas as pl
from jax.experimental.pallas import tpu as pltpu

H, W = 32, 64                       # fixed by mult(): y.view(-1, 1, 32, 64)
K = 3                               # k_size
N_CH = 8                            # "n" (number of conv channels)
LAYER_COUNT = -(-63 // K)           # ceil(63 / 3) = 21

HP, WP = H + 2, W + 2               # zero-padded image: 34 x 66
L_IMG = HP * WP                     # 2244 flattened (padded) pixels per image
L_PAD = -(-L_IMG // 128) * 128      # 2304: lane-aligned slab length per image
B_TILE = 8                          # images fused per grid step
C_BIG = B_TILE * N_CH               # 64 sublane rows per grid step
K_BIG = 3 * C_BIG                   # 192: contraction dim with row taps folded in


# --------------------------- roll semantics probe -----------------------------


@functools.cache
def _roll_sign() -> int:
    """Return +1 if pltpu.roll matches jnp.roll semantics, -1 if reversed."""

    def probe(x_ref, o_ref):
        o_ref[...] = pltpu.roll(x_ref[...], shift=1, axis=1)

    x = jnp.tile(jnp.arange(256, dtype=jnp.float32)[None, :], (8, 1))
    y = np.asarray(pl.pallas_call(
        probe, out_shape=jax.ShapeDtypeStruct((8, 256), jnp.float32))(x))
    if np.array_equal(y, np.asarray(jnp.roll(x, 1, axis=1))):
        return 1
    if np.array_equal(y, np.asarray(jnp.roll(x, -1, axis=1))):
        return -1
    raise RuntimeError("unexpected pltpu.roll semantics")


# ------------------------------- kernel ---------------------------------------


def _make_kernel(roll_sign: int):
    # jnp.roll semantics: roll(f, s)[p] = f[p - s].  Desired reads:
    #   up    : feat[p - WP]   -> jnp shift +WP
    #   down  : feat[p + WP]   -> jnp shift -WP
    #   left  : part[p - 1]    -> jnp shift +1
    #   right : part[p + 1]    -> jnp shift -1
    s_up = (roll_sign * WP) % L_PAD
    s_dn = (roll_sign * (-WP)) % L_PAD
    s_l = (roll_sign * 1) % L_PAD
    s_r = (roll_sign * (-1)) % L_PAD

    def kernel(x_ref, w0_ref, w_ref, b_ref, wl_ref, bl_ref, mask_ref, o_ref):
        x = x_ref[...]                              # (B_TILE, L_PAD) f32
        mask = mask_ref[...]                        # (1, L_PAD) f32 (interior=1)

        def make_stack(f):
            # [row-above; center; row-below] stacked along sublanes (contraction).
            up = pltpu.roll(f, shift=s_up, axis=1)
            dn = pltpu.roll(f, shift=s_dn, axis=1)
            return jnp.concatenate([up, f, dn], axis=0)

        def conv_step(stack, w0, w1c, w2, bias):
            # One dot per column tap dj; row-tap (di) accumulation is inside the
            # MXU (K = stack rows); f32 accumulation via preferred_element_type.
            p0 = jnp.dot(w0, stack, preferred_element_type=jnp.float32)
            p1 = jnp.dot(w1c, stack, preferred_element_type=jnp.float32)
            p2 = jnp.dot(w2, stack, preferred_element_type=jnp.float32)
            acc = (p1
                   + pltpu.roll(p0, shift=s_l, axis=1)
                   + pltpu.roll(p2, shift=s_r, axis=1))
            # Dropout2d layers of the PyTorch module are identity in eval mode.
            # Mask re-zeroes the per-image padding frame (= 'same' zero padding).
            return jnp.maximum(acc + bias, 0.0) * mask

        # Layer 0: Cin = 1, consumes the raw image slab directly (K = 24, f32).
        feat0 = conv_step(make_stack(x),
                          w0_ref[0], w0_ref[1], w0_ref[2], b_ref[0])

        # Layers 1..20: uniform K = 192, bf16 operands, f32 accumulate/elementwise.
        def layer(l, feat):
            stack = make_stack(feat.astype(jnp.bfloat16))
            i = (l - 1) * 3
            return conv_step(stack, w_ref[i], w_ref[i + 1], w_ref[i + 2],
                             b_ref[l])

        feat = lax.fori_loop(1, LAYER_COUNT, layer, feat0, unroll=4)

        # Final 1x1 conv (N_CH -> 1) + bias, then mult(): out = conv(x) * x.
        # Frame / tail lanes are zeroed by multiplying with x (zero-padded).
        z = jnp.dot(wl_ref[...], feat, preferred_element_type=jnp.float32)
        o_ref[...] = (z + bl_ref[...]) * x

    return kernel


# --------------------------- host-side weight packing --------------------------


def _pack_params(params):
    w1, b1, wm, bm, wl, bl = params
    eye = jnp.eye(B_TILE, dtype=jnp.float32)

    # Layer 0 (Cin = 1): per-dj (C_BIG, 3*B_TILE) block-diagonal weights, f32.
    # w1: (3, 3, 1, N_CH) indexed [di, dj, 0, co].
    w0_big = jnp.einsum("deo,bc->ebodc", w1[:, :, 0, :], eye)
    w0_big = w0_big.reshape(3, C_BIG, 3 * B_TILE)

    # Layers 1..20: per-(layer, dj) (C_BIG, K_BIG) block-diagonal weights with
    # the 3 row taps folded into the contraction dim; stored bf16 for single-pass
    # MXU ingestion.  wm: (L-1, 3, 3, Cin, Cout) indexed [l, di, dj, ci, co].
    w_big = jnp.einsum("ldeio,bc->lebodci", wm, eye)
    w_big = w_big.reshape((LAYER_COUNT - 1) * 3, C_BIG, K_BIG).astype(jnp.bfloat16)

    # Per-layer biases tiled across the fused images -> (layer, C_BIG, 1), f32.
    b_all = jnp.concatenate(
        [b1.reshape(1, N_CH), bm.reshape(LAYER_COUNT - 1, N_CH)], axis=0)
    b_big = jnp.tile(b_all[:, None, :], (1, B_TILE, 1)).reshape(LAYER_COUNT, C_BIG, 1)

    # Final 1x1 conv: block-diagonal rows (B_TILE, C_BIG) + scalar bias (1, 1), f32.
    wl_big = (eye[:, :, None] * wl.reshape(1, 1, N_CH)).reshape(B_TILE, C_BIG)
    bl_s = bl.reshape(1, 1)

    # Interior mask over the flattened padded image (zero on frame + lane tail).
    m = jnp.zeros((HP, WP), jnp.float32).at[1:H + 1, 1:W + 1].set(1.0)
    mask = jnp.pad(m.reshape(1, L_IMG), ((0, 0), (0, L_PAD - L_IMG)))

    return w0_big, w_big, b_big, wl_big, bl_s, mask


# ------------------------------- wrapper ---------------------------------------


@functools.partial(jax.jit, static_argnums=(2,))
def _forward(x_nchw, params, roll_sign):
    w0_big, w_big, b_big, wl_big, bl_s, mask = _pack_params(params)

    B = x_nchw.shape[0]
    Bp = -(-B // B_TILE) * B_TILE
    x_img = jnp.pad(x_nchw[:, 0].astype(jnp.float32),
                    ((0, Bp - B), (1, 1), (1, 1)))                 # (Bp, 34, 66)
    x_flat = jnp.pad(x_img.reshape(Bp, L_IMG), ((0, 0), (0, L_PAD - L_IMG)))

    def full(a):
        nd = a.ndim
        return pl.BlockSpec(a.shape, lambda i, _nd=nd: (0,) * _nd)

    out_flat = pl.pallas_call(
        _make_kernel(roll_sign),
        out_shape=jax.ShapeDtypeStruct((Bp, L_PAD), jnp.float32),
        grid=(Bp // B_TILE,),
        in_specs=[
            pl.BlockSpec((B_TILE, L_PAD), lambda i: (i, 0)),
            full(w0_big), full(w_big), full(b_big),
            full(wl_big), full(bl_s), full(mask),
        ],
        out_specs=pl.BlockSpec((B_TILE, L_PAD), lambda i: (i, 0)),
        compiler_params=pltpu.CompilerParams(
            dimension_semantics=("parallel",),
            vmem_limit_bytes=32 * 1024 * 1024,
        ),
    )(x_flat, w0_big, w_big, b_big, wl_big, bl_s, mask)

    out = out_flat[:B, :L_IMG].reshape(B, HP, WP)[:, 1:H + 1, 1:W + 1]
    return out[:, None, :, :]


def viscosity_net2(x_nchw, params):
    """x_nchw: (B, 1, 32, 64) float32, like the PyTorch module.  Returns NCHW."""
    return _forward(x_nchw, params, _roll_sign())


# ----------------------------- params / reference -----------------------------


def init_params(key):
    ks = jax.random.split(key, 6)

    def he_uniform(k, shape, fan_in):
        bound = (6.0 / fan_in) ** 0.5
        return jax.random.uniform(k, shape, jnp.float32, -bound, bound)

    w1 = he_uniform(ks[0], (K, K, 1, N_CH), 1 * K * K)
    b1 = jax.random.uniform(ks[1], (1, 1, N_CH), jnp.float32, -0.05, 0.05)
    wm = he_uniform(ks[2], (LAYER_COUNT - 1, K, K, N_CH, N_CH), N_CH * K * K)
    bm = jax.random.uniform(ks[3], (LAYER_COUNT - 1, 1, 1, N_CH), jnp.float32, -0.05, 0.05)
    wl = he_uniform(ks[4], (N_CH, 1), N_CH)
    bl = jax.random.uniform(ks[5], (1, 1, 1), jnp.float32, -0.05, 0.05)
    return w1, b1, wm, bm, wl, bl


def reference_forward(x_nchw, params):
    """Pure-JAX reference (NHWC convs, full f32), mirrors the PyTorch forward."""
    w1, b1, wm, bm, wl, bl = params
    x = jnp.transpose(x_nchw, (0, 2, 3, 1))
    dn = ("NHWC", "HWIO", "NHWC")
    hp = lax.Precision.HIGHEST
    y = lax.conv_general_dilated(x, w1, (1, 1), "SAME",
                                 dimension_numbers=dn, precision=hp)
    y = jax.nn.relu(y + b1.reshape(1, 1, 1, -1))
    for l in range(LAYER_COUNT - 1):
        y = lax.conv_general_dilated(y, wm[l], (1, 1), "SAME",
                                     dimension_numbers=dn, precision=hp)
        y = jax.nn.relu(y + bm[l].reshape(1, 1, 1, -1))
    y = jnp.einsum("bhwc,co->bhwo", y, wl, precision=hp) + bl.reshape(1, 1, 1, -1)
    y = y * x
    return jnp.transpose(y, (0, 3, 1, 2))


# ----------------------------- main -------------------------------------------


if __name__ == "__main__":
    key = jax.random.PRNGKey(0)
    kx, kp = jax.random.split(key)

    # B=12 pads to 16 -> grid of 2 steps, so the "parallel" batch axis actually
    # engages both TensorCores on v7x (and exercises the batch-padding path).
    B = 12
    x = jax.random.normal(kx, (B, 1, H, W), jnp.float32)   # NCHW, C=1, 32x64
    params = init_params(kp)

    out = viscosity_net2(x, params)
    out = jax.block_until_ready(out)
    assert out.shape == (B, 1, H, W)

    ref = reference_forward(x, params)
    # Tolerance accounts for bf16 matmul operands (f32 accumulation) chained
    # across 21 conv layers vs. the full-f32 reference.
    rel_err = float(jnp.max(jnp.abs(out - ref)) / (jnp.max(jnp.abs(ref)) + 1e-6))
    assert rel_err < 5e-2, f"kernel vs reference mismatch: rel err {rel_err}"

    print("KERNEL_OK")
</pallas_src>

<mosaic_0001>
module attributes {stable_mosaic.version = 11 : i64} {
  func.func @probe(%arg0: memref<8x256xf32, #tpu.memory_space<vmem>>, %arg1: memref<8x256xf32, #tpu.memory_space<vmem>>) attributes {dimension_semantics = [], scalar_prefetch = 0 : i64, scratch_operands = 0 : i64, tpu.core_type = #tpu.core_type<tc>} {
    %c0 = arith.constant 0 : index
    %c0_0 = arith.constant 0 : index
    %0 = vector.load %arg0[%c0, %c0_0] : memref<8x256xf32, #tpu.memory_space<vmem>>, vector<8x256xf32>
    %c1_i32 = arith.constant 1 : i32
    %1 = tpu.dynamic_rotate %0 by %c1_i32 dim 1 : vector<8x256xf32>, i32 -> vector<8x256xf32>
    %c0_1 = arith.constant 0 : index
    %c0_2 = arith.constant 0 : index
    %2 = vector.load %arg1[%c0_1, %c0_2] : memref<8x256xf32, #tpu.memory_space<vmem>>, vector<8x256xf32>
    tpu.vector_store %arg1[%c0_1, %c0_2], %1 {strides = array<i32>} : memref<8x256xf32, #tpu.memory_space<vmem>>, vector<8x256xf32>,
    return
  }
}

</mosaic_0001>

<bundles_post_ra>
// kernel: tpu_custom_call.1
= control target key start
LH: loop header
LB: loop body
LE: loop exit
PB: predicated region body
PF: predicated region fallthrough
CT: control target
= control target key end

     0   :  { %6 = vsyncpa [#allocation3], 0  ;;  %s115_s0 = inlined_call_operand.hbm [shape: f32[8,256], index: 0, kind: input, shape index: {}]   ;;  %s116_s1 = inlined_call_operand.hbm [shape: f32[8,256], index: 1, kind: output, shape index: {}]  }
   0x1   :  { %7 = vsyncpa [#allocation4], 0  ;;  %s96_s6 = smov [#allocation2]  }
   0x2   :  { %s14_s7 = sshll.u32 %s96_s6, 4  ;;  %s15_s7 = int_to_ptr.vmem [resolvable:$true] %s14_s7 }
   0x3   :  { %s60_s8 = scalar_lea.vmem %s15_s7, 256  ;;  %p65_p1 = scmp.lt.s32.totalorder %s15_s7, %s15_s7 }
   0x4   :  { %p61_p0 = scmp.ne.s32.totalorder %s15_s7, %s60_s8  ;;  %p66_p2 = scmp.lt.s32.totalorder %s60_s8, %s60_s8 }
   0x6   :  { %p67_p3 = por %p66_p2, %p65_p1 }
   0x8   :  { %p68_p4 = pnand %p67_p3, %p61_p0 }
   0xa   :  { %71 = shalt.err (!%p68_p4)
}
   0xb   :  { %17 = dma.hbm_to_vmem [thread:$0]  %s115_s0, 256, %s15_s7, [#allocation3]  }
   0xc   :  { %92 = dma.done.wait [#allocation3], 256  }
   0xd   :  { %93 = vsyncadd [#allocation3], 4294967040  ;;  %v21_v0 = vld [vmem:[#allocation2] sm:$0xff]  ;;  %s97_s11 = smov 1   ;;  %v22_v1 = vld [vmem:[#allocation2 + $0x8] sm:$0xff]  ;;  %v27_v2 = vlaneseq  ;;  %s98_s12 = smov [#allocation5]  }
   0xe   :  { %23 = vrot.lane.b32.xlu0 %v21_v0, %s97_s11  ;;  %s40_s13 = sshll.u32 %s98_s12, 4  ;;  %s41_s13 = int_to_ptr.vmem [resolvable:$true] %s40_s13 }
   0xf   :  { %v28_v3 = vand.u32 127, %v27_v2  ;;  %s72_s0 = scalar_lea.vmem %s41_s13, 256  ;;  %p77_p6 = scmp.lt.s32.totalorder %s41_s13, %s41_s13 }
  0x10   :  { %p73_p5 = scmp.ne.s32.totalorder %s41_s13, %s72_s0  ;;  %p78_p7 = scmp.lt.s32.totalorder %s72_s0, %s72_s0 }
  0x11   :  { %vm29_vm0 = vcmp.lt.s32.totalorder %v28_v3, 1 }
  0x12   :  { %25 = vrot.lane.b32.xlu0 %v22_v1, %s97_s11  ;;  %p79_p8 = por %p78_p7, %p77_p6 }
  0x14   :  { %p80_p9 = pnand %p79_p8, %p73_p5 }
  0x80   :  { %v24_v4 = vpop.permute.xlu0 %23 }
  0x84   :  { %v26_v5 = vpop.permute.xlu0 %25 }
  0x85   :  { %v30_v6 = vsel %vm29_vm0, %v24_v4, %v26_v5  ;;  %v31_v7 = vsel %vm29_vm0, %v26_v5, %v24_v4 }
  0x86   :  { %32 = vst [vmem:[#allocation5] sm:$0xff] %v31_v7  ;;  %33 = vst [vmem:[#allocation5 + $0x8] sm:$0xff] %v30_v6 }
  0x87   :  { %83 = shalt.err (!%p80_p9)
}
  0x88   :  { %43 = dma.vmem_to_hbm [thread:$0]  %s41_s13, 256, %s116_s1, [#allocation4]  }
  0x89   :  { %94 = dma.done.wait [#allocation4], 256  }
  0x8a   :  { %95 = vsyncadd [#allocation4], 4294967040 }
  0x8b   :  { %47 = vsyncpa [#allocation3], 1 }
  0x8c   :  { %48 = vsyncpa [#allocation4], 1 }

</bundles_post_ra>
